<compile_context>
chip_gen: v6e
topology: v6e:2x2x1
jax: 0.10.0
libtpu: 0.0.40
codegen_flags: <defaults>
</compile_context>

<pallas_src>
import math

import jax
import jax.numpy as jnp
from jax.experimental import pallas as pl
from jax.experimental.pallas import tpu as pltpu


def _round_up(n, m):
    return ((n + m - 1) // m) * m


def _pad_to(a, shape):
    pads = [(0, t - s) for s, t in zip(a.shape, shape)]
    if all(p == (0, 0) for p in pads):
        return a
    return jnp.pad(a, pads)


def _vmem_capacity_bytes():
    try:
        info = pltpu.get_tpu_info()
        cap = int(getattr(info, "vmem_capacity_bytes", 0) or 0)
        if cap > 0:
            return cap
    except Exception:
        pass
    return 64 << 20  # conservative fallback (v7x-sized VMEM)


def make_mlp_kernel(hb, th, use_tanh_gelu=False):
    """Kernel over one [tm, Dp] row tile and one [.., hb] hidden super-block."""
    inv_sqrt2 = 1.0 / math.sqrt(2.0)

    def gelu(h):
        if use_tanh_gelu:
            # tanh approximation: transcendental lands on the EUP slot (cheap),
            # slight deviation from torch's exact erf GELU -> opt-in only.
            c = math.sqrt(2.0 / math.pi)
            return 0.5 * h * (1.0 + jnp.tanh(c * (h + 0.044715 * h * h * h)))
        return 0.5 * h * (1.0 + jax.lax.erf(h * inv_sqrt2))

    def kernel(x_ref, w1_ref, b1_ref, w2_ref, b2_ref, o_ref, acc_ref):
        j = pl.program_id(1)

        @pl.when(j == 0)
        def _():
            acc_ref[...] = jnp.zeros_like(acc_ref)

        x = x_ref[...]
        # Unrolled chunk loop over the resident H block: the fc1 matmul of
        # chunk c+1 is independent of the GELU VALU work of chunk c, so the
        # scheduler overlaps MXU and VPU instead of serializing them.
        for start in range(0, hb, th):
            size = min(th, hb - start)
            sl = slice(start, start + size)
            h = jnp.dot(x, w1_ref[:, sl], preferred_element_type=jnp.float32)
            h = h + b1_ref[:, sl].astype(jnp.float32)
            h = gelu(h)
            # Cast back to the activation dtype so bf16 runs feed the bf16 MXU
            # path for fc2 (f32 path unchanged).
            h = h.astype(x.dtype)
            acc_ref[...] += jnp.dot(
                h, w2_ref[sl, :], preferred_element_type=jnp.float32
            )

        @pl.when(j == pl.num_programs(1) - 1)
        def _():
            o_ref[...] = (
                acc_ref[...] + b2_ref[...].astype(jnp.float32)
            ).astype(o_ref.dtype)

    return kernel


def mlp_pallas(x2d, w1, b1, w2, b2, *, tm=None, th=512, use_tanh_gelu=False):
    """x2d:[M,D], w1:[D,H], b1:[1,H], w2:[H,O], b2:[1,O] -> [M,O]."""
    M, D = x2d.shape
    H = w1.shape[1]
    O = w2.shape[1]
    dtype = x2d.dtype
    itemsize = jnp.dtype(dtype).itemsize

    cap = _vmem_capacity_bytes()
    budget = int(cap * 0.82)  # leave headroom for Mosaic internal scratch

    # Row tile: 512 on 128-MiB-VMEM chips (v5e/v6e), 256 on v7x; sublane
    # aligned; clamped to the actual (rounded) row count.
    sub = 8 if itemsize >= 4 else 16
    if tm is None:
        tm = 512 if cap >= (100 << 20) else 256
    tm = max(sub, _round_up(tm, sub))
    tm = min(tm, _round_up(M, sub))

    # Lane-dense padding (multiples of 128) keeps every store unmasked.
    Dp = _round_up(D, 128)
    Op = _round_up(O, 128)
    Hp = _round_up(H, 128)
    th = max(128, min(_round_up(th, 128), Hp))
    Mp = _round_up(M, tm)

    # --- plan H super-blocks so the per-step resident footprint fits VMEM ---
    def footprint(hb, n_hb):
        nbuf = 1 if n_hb == 1 else 2  # Buffered(1) only for constant index maps
        return (
            2 * tm * Dp * itemsize                          # x tiles (dbl buf)
            + 2 * tm * Op * itemsize                        # out tiles (dbl buf)
            + nbuf * (Dp * hb + hb * Op + hb) * itemsize    # w1 / w2 / b1 blocks
            + Op * itemsize                                 # b2 (single buffer)
            + tm * Op * 4                                   # f32 accumulator
            + tm * hb * (4 + itemsize)                      # f32 h + cast copy
            + (2 << 20)                                     # slack
        )

    n_hb = 1
    while True:
        hb = _round_up(-(-Hp // n_hb), 128)
        est = footprint(hb, n_hb)
        if est <= budget or hb <= 128 or n_hb >= 256:
            break
        n_hb += 1
    Hp_pad = n_hb * hb
    single_w = n_hb == 1

    # Zero padding is exact: GELU(0)=0 and padded w2 rows / b are zero.
    xp = _pad_to(x2d, (Mp, Dp))
    w1p = _pad_to(w1, (Dp, Hp_pad))
    b1p = _pad_to(b1.reshape(1, -1), (1, Hp_pad))
    w2p = _pad_to(w2, (Hp_pad, Op))
    b2p = _pad_to(b2.reshape(1, -1), (1, Op))

    def wspec(shape, imap, single):
        if single:
            return pl.BlockSpec(shape, imap, pipeline_mode=pl.Buffered(1))
        return pl.BlockSpec(shape, imap)

    in_specs = [
        pl.BlockSpec((tm, Dp), lambda i, j: (i, 0)),          # x row tile
        wspec((Dp, hb), lambda i, j: (0, j), single_w),        # w1 H-block
        wspec((1, hb), lambda i, j: (0, j), single_w),         # b1 H-block
        wspec((hb, Op), lambda i, j: (j, 0), single_w),        # w2 H-block
        wspec((1, Op), lambda i, j: (0, 0), True),             # b2 (constant)
    ]
    out_specs = pl.BlockSpec((tm, Op), lambda i, j: (i, 0))

    m_tiles = Mp // tm
    w_reads = 1 if single_w else m_tiles
    cost = pl.CostEstimate(
        flops=2 * Mp * Dp * Hp_pad + 2 * Mp * Hp_pad * Op,
        transcendentals=Mp * Hp_pad,
        bytes_accessed=itemsize
        * (Mp * Dp + Mp * Op + w_reads * (Dp * Hp_pad + Hp_pad * Op + Hp_pad) + Op),
    )

    vmem_limit = int(min(max(est, 32 << 20), budget))

    out = pl.pallas_call(
        make_mlp_kernel(hb, th, use_tanh_gelu),
        out_shape=jax.ShapeDtypeStruct((Mp, Op), dtype),
        grid_spec=pltpu.PrefetchScalarGridSpec(
            num_scalar_prefetch=0,
            grid=(m_tiles, n_hb),
            in_specs=in_specs,
            out_specs=out_specs,
            scratch_shapes=[pltpu.VMEM((tm, Op), jnp.float32)],
        ),
        compiler_params=pltpu.CompilerParams(
            dimension_semantics=("parallel", "arbitrary"),
            vmem_limit_bytes=vmem_limit,
        ),
        cost_estimate=cost,
    )(xp, w1p, b1p, w2p, b2p)

    return out[:M, :O]


def mlp_forward(x, w1, b1, w2, b2, *, tm=None, th=512, use_tanh_gelu=False):
    B, N, D = x.shape
    O = w2.shape[1]
    y = mlp_pallas(
        x.reshape(B * N, D), w1, b1, w2, b2, tm=tm, th=th, use_tanh_gelu=use_tanh_gelu
    )
    return y.reshape(B, N, O)


def init_linear(key, fan_in, fan_out, dtype=jnp.float32):
    # Matches nn.Linear default init: U(-1/sqrt(fan_in), 1/sqrt(fan_in)).
    kw, kb = jax.random.split(key)
    bound = 1.0 / math.sqrt(fan_in)
    w = jax.random.uniform(kw, (fan_in, fan_out), dtype, -bound, bound)
    b = jax.random.uniform(kb, (1, fan_out), dtype, -bound, bound)
    return w, b


def mlp_reference(x, w1, b1, w2, b2):
    h = jnp.einsum("bnd,dh->bnh", x, w1) + b1[0]
    h = 0.5 * h * (1.0 + jax.lax.erf(h / jnp.sqrt(2.0)))
    return jnp.einsum("bnh,ho->bno", h, w2) + b2[0]


if __name__ == "__main__":
    # Small ViT-like shapes: batch=2, seq=8, embed dim=32 -> hidden=128, out=32.
    B, N, D = 2, 8, 32
    H, O = 4 * D, D

    key = jax.random.PRNGKey(0)
    kx, k1, k2 = jax.random.split(key, 3)

    x = jax.random.normal(kx, (B, N, D), jnp.float32)
    w1, b1 = init_linear(k1, D, H)
    w2, b2 = init_linear(k2, H, O)

    out = mlp_forward(x, w1, b1, w2, b2)
    out = jax.block_until_ready(out)

    ref = mlp_reference(x, w1, b1, w2, b2)
    assert out.shape == (B, N, O)
    assert jnp.allclose(out, ref, atol=1e-5, rtol=1e-5), "mismatch vs reference"

    print("KERNEL_OK")
</pallas_src>

<mosaic_0001>
module attributes {stable_mosaic.version = 11 : i64} {
  func.func @kernel(%arg0: i32, %arg1: i32, %arg2: memref<16x128xf32, #tpu.memory_space<vmem>>, %arg3: memref<128x128xf32, #tpu.memory_space<vmem>>, %arg4: memref<1x128xf32, #tpu.memory_space<vmem>>, %arg5: memref<128x128xf32, #tpu.memory_space<vmem>>, %arg6: memref<1x128xf32, #tpu.memory_space<vmem>>, %arg7: memref<16x128xf32, #tpu.memory_space<vmem>>, %arg8: memref<16x128xf32, #tpu.memory_space<vmem>>) attributes {dimension_semantics = [#tpu.dimension_semantics<parallel>, #tpu.dimension_semantics<arbitrary>], iteration_bounds = array<i64: 1, 1>, scalar_prefetch = 0 : i64, scratch_operands = 1 : i64, tpu.core_type = #tpu.core_type<tc>, window_params = [{transform_indices = @transform_0, window_bounds = array<i64: 16, 128>}, {pipeline_mode = #tpu.pipeline_mode<synchronous>, transform_indices = @transform_1, window_bounds = array<i64: 128, 128>}, {pipeline_mode = #tpu.pipeline_mode<synchronous>, transform_indices = @transform_2, window_bounds = array<i64: 1, 128>}, {pipeline_mode = #tpu.pipeline_mode<synchronous>, transform_indices = @transform_3, window_bounds = array<i64: 128, 128>}, {pipeline_mode = #tpu.pipeline_mode<synchronous>, transform_indices = @transform_4, window_bounds = array<i64: 1, 128>}, {transform_indices = @transform_5, window_bounds = array<i64: 16, 128>}]} {
    %c0_i32 = arith.constant 0 : i32
    %0 = arith.cmpi eq, %arg1, %c0_i32 : i32
    %1 = arith.extui %0 : i1 to i32
    %c0_i32_0 = arith.constant 0 : i32
    %2 = arith.cmpi ne, %1, %c0_i32_0 : i32
    scf.if %2 {
      %cst_18 = arith.constant 0.000000e+00 : f32
      %25 = vector.broadcast %cst_18 : f32 to vector<16x128xf32>
      %c0_19 = arith.constant 0 : index
      %c0_20 = arith.constant 0 : index
      %26 = vector.load %arg8[%c0_19, %c0_20] : memref<16x128xf32, #tpu.memory_space<vmem>>, vector<16x128xf32>
      tpu.vector_store %arg8[%c0_19, %c0_20], %25 {strides = array<i32>} : memref<16x128xf32, #tpu.memory_space<vmem>>, vector<16x128xf32>,
    } else {
    }
    %c0 = arith.constant 0 : index
    %c0_1 = arith.constant 0 : index
    %3 = vector.load %arg2[%c0, %c0_1] : memref<16x128xf32, #tpu.memory_space<vmem>>, vector<16x128xf32>
    %c0_2 = arith.constant 0 : index
    %c0_3 = arith.constant 0 : index
    %4 = vector.load %arg3[%c0_2, %c0_3] : memref<128x128xf32, #tpu.memory_space<vmem>>, vector<128x128xf32>
    %cst = arith.constant dense<0.000000e+00> : vector<16x128xf32>
    %5 = tpu.matmul %3, %4, %cst {dimension_numbers = #tpu.dot_dimension_numbers<[1], [0], [0], [1], [0, 0, 1, 1], [], []>} : vector<16x128xf32>, vector<128x128xf32>, vector<16x128xf32> -> vector<16x128xf32>
    %c0_4 = arith.constant 0 : index
    %c0_5 = arith.constant 0 : index
    %6 = vector.load %arg4[%c0_4, %c0_5] : memref<1x128xf32, #tpu.memory_space<vmem>>, vector<1x128xf32>
    %7 = vector.broadcast %6 : vector<1x128xf32> to vector<16x128xf32>
    %8 = arith.addf %5, %7 : vector<16x128xf32>
    %cst_6 = arith.constant 5.000000e-01 : f32
    %9 = vector.broadcast %cst_6 : f32 to vector<16x128xf32>
    %10 = arith.mulf %9, %8 : vector<16x128xf32>
    %cst_7 = arith.constant 0.707106769 : f32
    %11 = vector.broadcast %cst_7 : f32 to vector<16x128xf32>
    %12 = arith.mulf %8, %11 : vector<16x128xf32>
    %13 = math.erf %12 : vector<16x128xf32>
    %cst_8 = arith.constant 1.000000e+00 : f32
    %14 = vector.broadcast %cst_8 : f32 to vector<16x128xf32>
    %15 = arith.addf %14, %13 : vector<16x128xf32>
    %16 = arith.mulf %10, %15 : vector<16x128xf32>
    %c0_9 = arith.constant 0 : index
    %c0_10 = arith.constant 0 : index
    %17 = vector.load %arg8[%c0_9, %c0_10] : memref<16x128xf32, #tpu.memory_space<vmem>>, vector<16x128xf32>
    %c0_11 = arith.constant 0 : index
    %c0_12 = arith.constant 0 : index
    %18 = vector.load %arg5[%c0_11, %c0_12] : memref<128x128xf32, #tpu.memory_space<vmem>>, vector<128x128xf32>
    %cst_13 = arith.constant dense<0.000000e+00> : vector<16x128xf32>
    %19 = tpu.matmul %16, %18, %cst_13 {dimension_numbers = #tpu.dot_dimension_numbers<[1], [0], [0], [1], [0, 0, 1, 1], [], []>} : vector<16x128xf32>, vector<128x128xf32>, vector<16x128xf32> -> vector<16x128xf32>
    %20 = arith.addf %17, %19 : vector<16x128xf32>
    %c0_14 = arith.constant 0 : index
    %c0_15 = arith.constant 0 : index
    %21 = vector.load %arg8[%c0_14, %c0_15] : memref<16x128xf32, #tpu.memory_space<vmem>>, vector<16x128xf32>
    tpu.vector_store %arg8[%c0_14, %c0_15], %20 {strides = array<i32>} : memref<16x128xf32, #tpu.memory_space<vmem>>, vector<16x128xf32>,
    %c0_i32_16 = arith.constant 0 : i32
    %22 = arith.cmpi eq, %arg1, %c0_i32_16 : i32
    %23 = arith.extui %22 : i1 to i32
    %c0_i32_17 = arith.constant 0 : i32
    %24 = arith.cmpi ne, %23, %c0_i32_17 : i32
    scf.if %24 {
      %c0_18 = arith.constant 0 : index
      %c0_19 = arith.constant 0 : index
      %25 = vector.load %arg8[%c0_18, %c0_19] : memref<16x128xf32, #tpu.memory_space<vmem>>, vector<16x128xf32>
      %c0_20 = arith.constant 0 : index
      %c0_21 = arith.constant 0 : index
      %26 = vector.load %arg6[%c0_20, %c0_21] : memref<1x128xf32, #tpu.memory_space<vmem>>, vector<1x128xf32>
      %27 = vector.broadcast %26 : vector<1x128xf32> to vector<16x128xf32>
      %28 = arith.addf %25, %27 : vector<16x128xf32>
      %c0_22 = arith.constant 0 : index
      %c0_23 = arith.constant 0 : index
      %29 = vector.load %arg7[%c0_22, %c0_23] : memref<16x128xf32, #tpu.memory_space<vmem>>, vector<16x128xf32>
      tpu.vector_store %arg7[%c0_22, %c0_23], %28 {strides = array<i32>} : memref<16x128xf32, #tpu.memory_space<vmem>>, vector<16x128xf32>,
    } else {
    }
    return
  }
  func.func @transform_0(%arg0: i32, %arg1: i32) -> (i32, i32) {
    %c0_i32 = arith.constant 0 : i32
    %c0_i32_0 = arith.constant 0 : i32
    return %arg0, %c0_i32 : i32, i32
  }
  func.func @transform_1(%arg0: i32, %arg1: i32) -> (i32, i32) {
    %c0_i32 = arith.constant 0 : i32
    %c0_i32_0 = arith.constant 0 : i32
    return %c0_i32, %arg1 : i32, i32
  }
  func.func @transform_2(%arg0: i32, %arg1: i32) -> (i32, i32) {
    %c0_i32 = arith.constant 0 : i32
    %c0_i32_0 = arith.constant 0 : i32
    return %c0_i32, %arg1 : i32, i32
  }
  func.func @transform_3(%arg0: i32, %arg1: i32) -> (i32, i32) {
    %c0_i32 = arith.constant 0 : i32
    %c0_i32_0 = arith.constant 0 : i32
    return %arg1, %c0_i32 : i32, i32
  }
  func.func @transform_4(%arg0: i32, %arg1: i32) -> (i32, i32) {
    %c0_i32 = arith.constant 0 : i32
    %c0_i32_0 = arith.constant 0 : i32
    %c0_i32_1 = arith.constant 0 : i32
    return %c0_i32, %c0_i32_0 : i32, i32
  }
  func.func @transform_5(%arg0: i32, %arg1: i32) -> (i32, i32) {
    %c0_i32 = arith.constant 0 : i32
    %c0_i32_0 = arith.constant 0 : i32
    return %arg0, %c0_i32 : i32, i32
  }
}

</mosaic_0001>

<bundles_post_ra>
// kernel: tpu_custom_call.1
= control target key start
LH: loop header
LB: loop body
LE: loop exit
PB: predicated region body
PF: predicated region fallthrough
CT: control target
= control target key end

     0   :  { %10 = vsyncpa [#allocation4], 0  ;;  %s579_s0 = inlined_call_operand.hbm [shape: f32[16,128], index: 0, kind: input, shape index: {}]   ;;  %s580_s1 = inlined_call_operand.hbm [shape: f32[128,128], index: 1, kind: input, shape index: {}]   ;;  %s581_s2 = inlined_call_operand.vmem [shape: f32[1,128], index: 2, kind: input, shape index: {}]   ;;  %s582_s3 = inlined_call_operand.hbm [shape: f32[128,128], index: 3, kind: input, shape index: {}]   ;;  %s583_s4 = inlined_call_operand.vmem [shape: f32[1,128], index: 4, kind: input, shape index: {}]   ;;  %s584_s5 = inlined_call_operand.hbm [shape: f32[16,128], index: 5, kind: output, shape index: {}]  }
   0x1   :  { %11 = vsyncpa [#allocation7], 0 }
   0x2   :  { %12 = vsyncpa [#allocation5], 0  ;;  %s513_s18 = smov [#allocation6]   ;;  %s514_s20 = smov [#allocation3]  }
   0x3   :  { %s30_s19 = sshll.u32 %s513_s18, 4  ;;  %s18_s21 = sshll.u32 %s514_s20, 4  ;;  %s31_s19 = int_to_ptr.vmem [resolvable:$true] %s30_s19  ;;  %s19_s21 = int_to_ptr.vmem [resolvable:$true] %s18_s21 }
   0x4   :  { %s435_s22 = scalar_lea.vmem %s31_s19, 2048  ;;  %p440_p1 = scmp.lt.s32.totalorder %s31_s19, %s31_s19 }
   0x5   :  { %p436_p0 = scmp.ne.s32.totalorder %s31_s19, %s435_s22  ;;  %p441_p2 = scmp.lt.s32.totalorder %s435_s22, %s435_s22 }
   0x7   :  { %p442_p3 = por %p441_p2, %p440_p1 }
   0x9   :  { %p443_p4 = pnand %p442_p3, %p436_p0 }
   0xb   :  { %446 = shalt.err (!%p443_p4)
}
   0xc   :  { %s515_s23 = smov 128   ;;  %s516_s24 = smov 8  }
   0xd   :  { %36 = dma.hbm_to_vmem [thread:$0]  %s580_s1, 2048, %s31_s19, [#allocation7], %s515_s23, %s515_s23, %s516_s24  }
   0xe   :  { %s455_s27 = scalar_lea.vmem %s19_s21, 256  ;;  %p460_p6 = scmp.lt.s32.totalorder %s19_s21, %s19_s21 }
   0xf   :  { %p456_p5 = scmp.ne.s32.totalorder %s19_s21, %s455_s27  ;;  %p461_p7 = scmp.lt.s32.totalorder %s455_s27, %s455_s27 }
  0x11   :  { %p462_p8 = por %p461_p7, %p460_p6 }
  0x13   :  { %p463_p9 = pnand %p462_p8, %p456_p5 }
  0x15   :  { %466 = shalt.err (!%p463_p9)
}
  0x16   :  { %24 = dma.hbm_to_vmem [thread:$0]  %s579_s0, 256, %s19_s21, [#allocation4], %s515_s23, %s515_s23, %s516_s24  }
  0x17   :  { %s517_s30 = smov [#allocation8]  }
  0x18   :  { %s44_s6 = sshll.u32 %s517_s30, 4  ;;  %s45_s6 = int_to_ptr.vmem [resolvable:$true] %s44_s6 }
  0x19   :  { %s475_s7 = scalar_lea.vmem %s45_s6, 2048  ;;  %p480_p11 = scmp.lt.s32.totalorder %s45_s6, %s45_s6 }
  0x1a   :  { %p476_p10 = scmp.ne.s32.totalorder %s45_s6, %s475_s7  ;;  %p481_p12 = scmp.lt.s32.totalorder %s475_s7, %s475_s7 }
  0x1c   :  { %p482_p13 = por %p481_p12, %p480_p11 }
  0x1e   :  { %p483_p0 = pnand %p482_p13, %p476_p10 }
  0x20   :  { %486 = shalt.err (!%p483_p0)
}
  0x21   :  { %50 = dma.hbm_to_vmem [thread:$0]  %s582_s3, 2048, %s45_s6, [#allocation7], %s515_s23, %s515_s23, %s516_s24  }
  0x22   :  { %507 = dma.done.wait [#allocation4], 256  }
  0x23   :  { %508 = vsyncadd [#allocation4], 4294967040 }
  0x24   :  { %509 = dma.done.wait [#allocation7], 4096  }
  0x25   :  { %510 = vsyncadd [#allocation7], 4294963200  ;;  %v85_v0 = vld [vmem:[#allocation6 + $0x78] sm:$0xff]  ;;  %v84_v1 = vld [vmem:[#allocation6 + $0x70] sm:$0xff]  ;;  %s518_s10 = smov [#allocation9]  }
  0x26   :  { %347 = vmatprep.subr.mxu0 %v85_v0  ;;  %v83_v2 = vld [vmem:[#allocation6 + $0x68] sm:$0xff]  ;;  %v82_v3 = vld [vmem:[#allocation6 + $0x60] sm:$0xff]  ;;  %v68_v4 = vld [vmem:[#allocation3] sm:$0xff]  ;;  %s296_s11 = sshll.u32 %s518_s10, 4  ;;  %s297_s11 = int_to_ptr.vmem [resolvable:$true] %s296_s11 }
  0x27   :  { %348 = vmatpush3.msra.mxu0 %v85_v0  ;;  %v81_v5 = vld [vmem:[#allocation6 + $0x58] sm:$0xff]  ;;  %379 = vmatprep.mubr.f32.mxu0 %v68_v4  ;;  %v194_v7 = vld [vmem:[#allocation8 + $0x70] sm:$0xff]  ;;  %v193_v9 = vld [vmem:[#allocation8 + $0x68] sm:$0xff]  ;;  %s487_s12 = scalar_lea.vmem %s297_s11, 256  ;;  %p492_p2 = scmp.lt.s32.totalorder %s297_s11, %s297_s11 }
  0x28   :  { %349 = vmatprep.subr.mxu0 %v84_v1  ;;  %v195_v6 = vld [vmem:[#allocation8 + $0x78] sm:$0xff]  ;;  %v80_v8 = vld [vmem:[#allocation6 + $0x50] sm:$0xff]  ;;  %v79_v10 = vld [vmem:[#allocation6 + $0x48] sm:$0xff]  ;;  %p488_p1 = scmp.ne.s32.totalorder %s297_s11, %s487_s12  ;;  %p493_p3 = scmp.lt.s32.totalorder %s487_s12, %s487_s12 }
  0x29   :  { %350 = vmatpush3.msra.mxu0 %v84_v1  ;;  %382 = vmatprep.subr.mxu1 %v195_v6  ;;  %v78_v11 = vld [vmem:[#allocation6 + $0x40] sm:$0xff]  ;;  %v77_v12 = vld [vmem:[#allocation6 + $0x38] sm:$0xff]  ;;  %v76_v13 = vld [vmem:[#allocation6 + $0x30] sm:$0xff] }
  0x2a   :  { %351 = vmatprep.subr.mxu0 %v83_v2  ;;  %383 = vmatpush3.msra.mxu1 %v195_v6  ;;  %v75_v14 = vld [vmem:[#allocation6 + $0x28] sm:$0xff]  ;;  %v74_v15 = vld [vmem:[#allocation6 + $0x20] sm:$0xff]  ;;  %v73_v16 = vld [vmem:[#allocation6 + $0x18] sm:$0xff]  ;;  %p494_p4 = por %p493_p3, %p492_p2 }
  0x2b   :  { %352 = vmatpush3.msra.mxu0 %v83_v2  ;;  %384 = vmatprep.subr.mxu1 %v194_v7  ;;  %v72_v17 = vld [vmem:[#allocation6 + $0x10] sm:$0xff]  ;;  %v71_v18 = vld [vmem:[#allocation6 + $0x8] sm:$0xff]  ;;  %v70_v19 = vld [vmem:[#allocation6] sm:$0xff] }
  0x2c   :  { %353 = vmatprep.subr.mxu0 %v82_v3  ;;  %385 = vmatpush3.msra.mxu1 %v194_v7  ;;  %v69_v20 = vld [vmem:[#allocation3 + $0x8] sm:$0xff]  ;;  %v192_v21 = vld [vmem:[#allocation8 + $0x60] sm:$0xff]  ;;  %v190_v23 = vld [vmem:[#allocation8 + $0x50] sm:$0xff]  ;;  %p495_p5 = pnand %p494_p4, %p488_p1 }
  0x2d   :  { %354 = vmatpush3.msra.mxu0 %v82_v3  ;;  %386 = vmatprep.subr.mxu1 %v193_v9  ;;  %v191_v22 = vld [vmem:[#allocation8 + $0x58] sm:$0xff]  ;;  %v189_v24 = vld [vmem:[#allocation8 + $0x48] sm:$0xff]  ;;  %v188_v25 = vld [vmem:[#allocation8 + $0x40] sm:$0xff] }
  0x2e   :  { %355 = vmatprep.subr.mxu0 %v81_v5  ;;  %387 = vmatpush3.msra.mxu1 %v193_v9  ;;  %v187_v26 = vld [vmem:[#allocation8 + $0x38] sm:$0xff]  ;;  %v186_v27 = vld [vmem:[#allocation8 + $0x30] sm:$0xff]  ;;  %v185_v28 = vld [vmem:[#allocation8 + $0x28] sm:$0xff] }
  0x2f   :  { %356 = vmatpush3.msra.mxu0 %v81_v5  ;;  %388 = vmatprep.subr.mxu1 %v192_v21  ;;  %v184_v29 = vld [vmem:[#allocation8 + $0x20] sm:$0xff]  ;;  %v183_v30 = vld [vmem:[#allocation8 + $0x18] sm:$0xff]  ;;  %v182_v31 = vld [vmem:[#allocation8 + $0x10] sm:$0xff] }
  0x30   :  { %357 = vmatprep.subr.mxu0 %v80_v8  ;;  %389 = vmatpush3.msra.mxu1 %v192_v21  ;;  %v181_v32 = vld [vmem:[#allocation8 + $0x8] sm:$0xff]  ;;  %v180_v33 = vld [vmem:[#allocation8] sm:$0xff]  ;;  %v309_v34 = vld [vmem:[%s581_s2] ss:$0 sm:$0xff] }
  0x31   :  { %358 = vmatpush3.msra.mxu0 %v80_v8  ;;  %390 = vmatprep.subr.mxu1 %v191_v22  ;;  %v310_v49 = vld [vmem:[%s583_s4] ss:$0 sm:$0xff] }
  0x32   :  { %359 = vmatprep.subr.mxu0 %v79_v10  ;;  %391 = vmatpush3.msra.mxu1 %v191_v22 }
  0x33   :  { %360 = vmatpush3.msra.mxu0 %v79_v10  ;;  %392 = vmatprep.subr.mxu1 %v190_v23 }
  0x34   :  { %361 = vmatprep.subr.mxu0 %v78_v11  ;;  %393 = vmatpush3.msra.mxu1 %v190_v23 }
  0x35   :  { %362 = vmatpush3.msra.mxu0 %v78_v11  ;;  %394 = vmatprep.subr.mxu1 %v189_v24 }
  0x36   :  { %363 = vmatprep.subr.mxu0 %v77_v12  ;;  %395 = vmatpush3.msra.mxu1 %v189_v24 }
  0x37   :  { %364 = vmatpush3.msra.mxu0 %v77_v12  ;;  %396 = vmatprep.subr.mxu1 %v188_v25 }
  0x38   :  { %365 = vmatprep.subr.mxu0 %v76_v13  ;;  %397 = vmatpush3.msra.mxu1 %v188_v25 }
  0x39   :  { %366 = vmatpush3.msra.mxu0 %v76_v13  ;;  %398 = vmatprep.subr.mxu1 %v187_v26 }
  0x3a   :  { %367 = vmatprep.subr.mxu0 %v75_v14  ;;  %399 = vmatpush3.msra.mxu1 %v187_v26 }
  0x3b   :  { %368 = vmatpush3.msra.mxu0 %v75_v14  ;;  %400 = vmatprep.subr.mxu1 %v186_v27 }
  0x3c   :  { %369 = vmatprep.subr.mxu0 %v74_v15  ;;  %401 = vmatpush3.msra.mxu1 %v186_v27 }
  0x3d   :  { %370 = vmatpush3.msra.mxu0 %v74_v15  ;;  %402 = vmatprep.subr.mxu1 %v185_v28 }
  0x3e   :  { %371 = vmatprep.subr.mxu0 %v73_v16  ;;  %403 = vmatpush3.msra.mxu1 %v185_v28 }
  0x3f   :  { %372 = vmatpush3.msra.mxu0 %v73_v16  ;;  %404 = vmatprep.subr.mxu1 %v184_v29 }
  0x40   :  { %373 = vmatprep.subr.mxu0 %v72_v17  ;;  %405 = vmatpush3.msra.mxu1 %v184_v29 }
  0x41   :  { %374 = vmatpush3.msra.mxu0 %v72_v17  ;;  %406 = vmatprep.subr.mxu1 %v183_v30 }
  0x42   :  { %375 = vmatprep.subr.mxu0 %v71_v18  ;;  %407 = vmatpush3.msra.mxu1 %v183_v30 }
  0x43   :  { %376 = vmatpush3.msra.mxu0 %v71_v18  ;;  %408 = vmatprep.subr.mxu1 %v182_v31 }
  0x44   :  { %377 = vmatprep.subr.mxu0 %v70_v19  ;;  %409 = vmatpush3.msra.mxu1 %v182_v31 }
  0x45   :  { %378 = vmatpush3.msra.mxu0 %v70_v19  ;;  %410 = vmatprep.subr.mxu1 %v181_v32 }
  0x46   :  { %380 = vmatmul.mubr.f32.vlgmr.msra.gmra.mxu0 %v69_v20  ;;  %411 = vmatpush3.msra.mxu1 %v181_v32 }
  0x47   :  { %412 = vmatprep.subr.mxu1 %v180_v33 }
  0x48   :  { %413 = vmatpush3.msra.mxu1 %v180_v33 }
 0x106   :  { %v381_v35 = vpop.f32.mrf.mxu0 }
 0x107   :  { %v165_v36 = vadd.f32 %v381_v35, %v309_v34 }
 0x108   :  { %v159_v37 = vpop.f32.mrf.mxu0 }
 0x109   :  { %v171_v38 = vmul.f32 0.70710677, %v165_v36  ;;  %v160_v39 = vadd.f32 %v309_v34, %v159_v37  ;;  %v169_v46 = vmul.f32 0.5, %v165_v36 }
 0x10b   :  { %423 = verf.f32 %v171_v38  ;;  %v170_v40 = vmul.f32 0.70710677, %v160_v39  ;;  %v168_v44 = vmul.f32 0.5, %v160_v39 }
 0x10d   :  { %425 = verf.f32 %v170_v40 }
 0x118   :  { %v424_v41 = vpop.eup %423 }
 0x119   :  { %v175_v43 = vadd.f32 1.0, %v424_v41 }
 0x11a   :  { %v426_v42 = vpop.eup %425 }
 0x11b   :  { %v174_v45 = vadd.f32 1.0, %v426_v42  ;;  %v177_v48 = vmul.f32 %v175_v43, %v169_v46 }
 0x11d   :  { %v176_v47 = vmul.f32 %v174_v45, %v168_v44 }
 0x11f   :  { %414 = vmatprep.mubr.f32.mxu1 %v176_v47 }
 0x120   :  { %415 = vmatmul.mubr.f32.vlgmr.msra.gmra.mxu1 %v177_v48 }
 0x1e0   :  { %v416_v50 = vpop.f32.mrf.mxu1 }
 0x1e1   :  { %v288_v51 = vadd.f32 %v416_v50, %v310_v49 }
 0x1e2   :  { %v262_v52 = vpop.f32.mrf.mxu1 }
 0x1e3   :  { %290 = vst [vmem:[#allocation9 + $0x8] sm:$0xff] %v288_v51  ;;  %v287_v53 = vadd.f32 %v310_v49, %v262_v52 }
 0x1e5   :  { %289 = vst [vmem:[#allocation9] sm:$0xff] %v287_v53 }
 0x1e6   :  { %498 = shalt.err (!%p495_p5)
}
 0x1e7   :  { %302 = dma.vmem_to_hbm [thread:$0]  %s297_s11, 256, %s584_s5, [#allocation5], %s515_s23, %s515_s23, %s516_s24  }
 0x1e8   :  { %511 = dma.done.wait [#allocation5], 256  }
 0x1e9   :  { %512 = vsyncadd [#allocation5], 4294967040 }
 0x1ea   :  { %306 = vsyncpa [#allocation4], 1 }
 0x1eb   :  { %307 = vsyncpa [#allocation7], 1 }
 0x1ec   :  { %308 = vsyncpa [#allocation5], 1 }

</bundles_post_ra>
